<compile_context>
chip_gen: v6e
topology: v6e:2x2x1
jax: 0.10.0
libtpu: 0.0.40
codegen_flags: <defaults>
</compile_context>

<pallas_src>
import numpy as np
import jax
import jax.numpy as jnp
from jax import lax
from jax.experimental import pallas as pl
from jax.experimental.pallas import tpu as pltpu


VC = 128  # vertex-chunk size == lane width


def _round_up(x, m):
    return (x + m - 1) // m * m


# --------------------------------------------------------------------------------------
# Projection (plain JAX): P = K @ (TCO @ DTO)[:3]; per-vertex pixel (col, row) or -1.
# --------------------------------------------------------------------------------------
def _project_vertices(TCO, DTO, K, verts, H, W):
    T = jnp.einsum('bij,bjk->bik', TCO.astype(jnp.float32), DTO.astype(jnp.float32))
    P = jnp.einsum('bij,bjk->bik', K.astype(jnp.float32), T[:, :3, :])       # (B, 3, 4)
    R = P[:, :, :3]
    tvec = P[:, :, 3]
    proj = jnp.einsum('bvj,bij->bvi', verts.astype(jnp.float32), R) + tvec[:, None, :]
    zc = proj[..., 2]
    valid = zc > 1e-6                                       # in front of the camera
    zs = jnp.where(valid, zc, 1.0)
    # TODO(synk): pytorch3d (cameras_from_opencv_projection + MeshRasterizer) pixel-center /
    # NDC conventions may shift this rounding by <= 0.5 px; verify against the reference.
    u = jnp.floor(proj[..., 0] / zs + 0.5)                  # pixel column
    w = jnp.floor(proj[..., 1] / zs + 0.5)                  # pixel row
    inb = valid & (u >= 0) & (u <= W - 1) & (w >= 0) & (w <= H - 1)
    u_i = jnp.where(inb, u, -1.0).astype(jnp.int32)         # -1 == never matches a pixel
    w_i = jnp.where(inb, w, -1.0).astype(jnp.int32)
    return u_i, w_i


# --------------------------------------------------------------------------------------
# Fused coverage-splat + mask + boundary kernel (MXU coverage, row-tile grid).
# --------------------------------------------------------------------------------------
def make_splat_contour_kernel(H, W, W_pad, TH, RH, n_chunks):
    def kernel(wmin_ref, wmax_ref, u_ref, w_ref, mask_ref, bnd_ref, hits_ref):
        b = pl.program_id(0)
        t = pl.program_id(1)
        r0 = t * TH - 1                                           # first (halo) image row
        row_ids = r0 + lax.broadcasted_iota(jnp.int32, (RH, 1), 0)       # (RH, 1)
        col_sub = lax.broadcasted_iota(jnp.int32, (W_pad, 1), 0)         # (W_pad, 1)

        hits_ref[...] = jnp.zeros_like(hits_ref)

        def chunk(c, carry):
            # Early-out: skip chunks with no vertex row inside [r0, r0 + TH + 1].
            @pl.when(jnp.logical_and(wmax_ref[b, c] >= r0,
                                     wmin_ref[b, c] <= r0 + TH + 1))
            def _():
                u_c = u_ref[0, pl.ds(c, 1), :]                    # (1, VC) int32, lane-major
                w_c = w_ref[0, pl.ds(c, 1), :]                    # (1, VC)
                # One-hots built once per chunk (no per-row broadcasts).
                row_oh = (row_ids == w_c).astype(jnp.float32).astype(jnp.bfloat16)   # (RH, VC)
                colT_oh = (col_sub == u_c).astype(jnp.float32).astype(jnp.bfloat16)  # (W_pad, VC)
                # Coverage on the MXU: hits[r, c] += sum_v row_oh[r, v] * colT_oh[c, v]
                hits_ref[...] += jnp.einsum('rv,cv->rc', row_oh, colT_oh,
                                            preferred_element_type=jnp.float32)
            return carry

        lax.fori_loop(0, n_chunks, chunk, 0)

        mask = (hits_ref[...] > 0.5).astype(jnp.float32)          # (RH, W_pad)

        # Boundary: foreground pixel with a background (or outside-image) 4-neighbour.
        up = mask[0:TH, :]                                        # image row r-1 (halo)
        center = mask[1:TH + 1, :]                                # image row r
        down = mask[2:TH + 2, :]                                  # image row r+1 (halo)
        left = pltpu.roll(center, 1, 1)                           # col c-1 (wraps)
        right = pltpu.roll(center, W_pad - 1, 1)                  # col c+1 (wraps)
        col2 = lax.broadcasted_iota(jnp.int32, (TH, W_pad), 1)
        left = jnp.where(col2 == 0, 0.0, left)                    # outside image = background
        right = jnp.where(col2 == (W - 1), 0.0, right)
        interior = up * down * left * right

        mask_ref[0] = center
        bnd_ref[0] = center * (1.0 - interior)

    return kernel


# --------------------------------------------------------------------------------------
# Wrapper
# --------------------------------------------------------------------------------------
def contour_rendering(TCO, DTO, K, verts, image_size):
    """JAX/Pallas equivalent of ContourRendering.forward tensor path.

    Returns (mask, boundary), each (B, H, W) float32.  (The z-buffer itself is not
    emitted: forward only consumes mask -> contours.)
    """
    H, W = image_size
    B, V, _ = verts.shape

    # ---- projection folded into the wrapper (tiny; XLA fuses it) ---------------------
    u_i, w_i = _project_vertices(TCO, DTO, K, verts, H, W)        # (B, V) int32 each

    V_pad = _round_up(V, VC)
    if V_pad != V:
        u_i = jnp.pad(u_i, ((0, 0), (0, V_pad - V)), constant_values=-1)
        w_i = jnp.pad(w_i, ((0, 0), (0, V_pad - V)), constant_values=-1)
    n_chunks = V_pad // VC
    u_ch = u_i.reshape(B, n_chunks, VC)                           # lane-dense vertex chunks
    w_ch = w_i.reshape(B, n_chunks, VC)

    # Per-chunk projected-row range for the in-kernel early-out (SMEM scalar prefetch).
    has = w_ch >= 0
    wmin = jnp.min(jnp.where(has, w_ch, jnp.int32(1 << 30)), axis=-1).astype(jnp.int32)
    wmax = jnp.max(jnp.where(has, w_ch, jnp.int32(-(1 << 30))), axis=-1).astype(jnp.int32)

    # ---- pixel tiling: lane-dense W, row-tile height dividing the padded height ------
    W_pad = _round_up(W, 128)
    H_pad = _round_up(H, 8)
    TH = min(H_pad, 32)
    while H_pad % TH != 0:
        TH -= 8
    n_row_tiles = H_pad // TH
    RH = _round_up(TH + 2, 8)                                     # tile rows + 1-row halos

    out_sds = jax.ShapeDtypeStruct((B, H_pad, W_pad), jnp.float32)
    mask_p, bnd_p = pl.pallas_call(
        make_splat_contour_kernel(H, W, W_pad, TH, RH, n_chunks),
        out_shape=(out_sds, out_sds),
        grid_spec=pltpu.PrefetchScalarGridSpec(
            num_scalar_prefetch=2,
            grid=(B, n_row_tiles),
            in_specs=[pl.BlockSpec((1, n_chunks, VC), lambda b, t, mn, mx: (b, 0, 0)),
                      pl.BlockSpec((1, n_chunks, VC), lambda b, t, mn, mx: (b, 0, 0))],
            out_specs=[pl.BlockSpec((1, TH, W_pad), lambda b, t, mn, mx: (b, t, 0)),
                       pl.BlockSpec((1, TH, W_pad), lambda b, t, mn, mx: (b, t, 0))],
            scratch_shapes=[pltpu.VMEM((RH, W_pad), jnp.float32)]),
        compiler_params=pltpu.CompilerParams(
            dimension_semantics=("parallel", "parallel")),
    )(wmin, wmax, u_ch, w_ch)

    return mask_p[:, :H, :W], bnd_p[:, :H, :W]


def extract_contour_points(boundary):
    # TODO(synk): cv2.findContours (RETR_EXTERNAL + CHAIN_APPROX_NONE) is a sequential,
    # data-dependent border-following algorithm; we return unordered boundary-pixel
    # coordinates in cv2's (x, y) convention instead of traced/ordered contours.
    b_np = np.asarray(boundary)
    out = []
    for i in range(b_np.shape[0]):
        ys, xs = np.nonzero(b_np[i] > 0.5)
        out.append(np.stack([xs, ys], axis=-1).astype(np.int32))
    return out


if __name__ == "__main__":
    B, V, H, W = 2, 64, 16, 16
    key = jax.random.PRNGKey(0)

    # Synthetic object "meshes" (vertex clouds, ~5 cm extent), deterministic.
    verts = jax.random.normal(key, (B, V, 3), dtype=jnp.float32) * 0.05

    eye = jnp.eye(4, dtype=jnp.float32)
    # x.TCO: object pose in camera frame (object ~0.5-0.6 m in front of camera)
    TCO = jnp.stack([
        eye.at[0, 3].set(0.02).at[2, 3].set(0.5),
        eye.at[1, 3].set(-0.03).at[2, 3].set(0.6),
    ])
    # x.DTO: small pose refinement
    DTO = jnp.stack([
        eye.at[2, 3].set(0.01),
        eye.at[0, 3].set(0.005),
    ])
    # x.K: pinhole intrinsics for a 16x16 image
    K = jnp.stack([jnp.array([[20.0, 0.0, 8.0],
                              [0.0, 20.0, 8.0],
                              [0.0, 0.0, 1.0]], dtype=jnp.float32)] * B)

    mask, boundary = contour_rendering(TCO, DTO, K, verts, (H, W))
    jax.block_until_ready((mask, boundary))
    contour_points_list = extract_contour_points(boundary)

    m = np.asarray(mask)
    bnd = np.asarray(boundary)

    # ---- reference check: splat the same projected vertices with numpy ----------------
    u_np, w_np = map(np.asarray, _project_vertices(TCO, DTO, K, verts, H, W))
    mask_ref = np.zeros((B, H, W), np.float32)
    for bi in range(B):
        for vi in range(V):
            if u_np[bi, vi] >= 0:
                mask_ref[bi, w_np[bi, vi], u_np[bi, vi]] = 1.0
    padded = np.pad(mask_ref, ((0, 0), (1, 1), (1, 1)))
    interior_ref = (padded[:, :-2, 1:-1] * padded[:, 2:, 1:-1] *
                    padded[:, 1:-1, :-2] * padded[:, 1:-1, 2:])
    bnd_ref = mask_ref * (1.0 - interior_ref)

    assert m.shape == (B, H, W) and bnd.shape == (B, H, W)
    assert np.isfinite(m).all() and np.isfinite(bnd).all()
    np.testing.assert_array_equal(m, mask_ref)
    np.testing.assert_array_equal(bnd, bnd_ref)
    assert m.sum() > 0
    assert all(c.ndim == 2 and c.shape[-1] == 2 for c in contour_points_list)

    print("KERNEL_OK")
</pallas_src>

<mosaic_0001>
module attributes {stable_mosaic.version = 11 : i64} {
  func.func @kernel(%arg0: i32, %arg1: i32, %arg2: memref<2x1xi32, #tpu.memory_space<smem>>, %arg3: memref<2x1xi32, #tpu.memory_space<smem>>, %arg4: memref<1x1x128xi32, #tpu.memory_space<vmem>>, %arg5: memref<1x1x128xi32, #tpu.memory_space<vmem>>, %arg6: memref<1x16x128xf32, #tpu.memory_space<vmem>>, %arg7: memref<1x16x128xf32, #tpu.memory_space<vmem>>, %arg8: memref<24x128xf32, #tpu.memory_space<vmem>>) attributes {dimension_semantics = [#tpu.dimension_semantics<parallel>, #tpu.dimension_semantics<parallel>], iteration_bounds = array<i64: 2, 1>, scalar_prefetch = 2 : i64, scratch_operands = 1 : i64, tpu.core_type = #tpu.core_type<tc>, window_params = [{transform_indices = @transform_0, window_bounds = array<i64: 1, 1, 128>}, {transform_indices = @transform_1, window_bounds = array<i64: 1, 1, 128>}, {transform_indices = @transform_2, window_bounds = array<i64: 1, 16, 128>}, {transform_indices = @transform_3, window_bounds = array<i64: 1, 16, 128>}]} {
    %c16_i32 = arith.constant 16 : i32
    %0 = arith.muli %arg1, %c16_i32 : i32
    %c1_i32 = arith.constant 1 : i32
    %1 = arith.subi %0, %c1_i32 : i32
    %2 = tpu.iota {dimensions = array<i32: 0>} : vector<24x1xi32>
    %3 = vector.broadcast %1 : i32 to vector<24x1xi32>
    %4 = arith.addi %3, %2 : vector<24x1xi32>
    %5 = tpu.iota {dimensions = array<i32: 0>} : vector<128x1xi32>
    %cst = arith.constant 0.000000e+00 : f32
    %6 = vector.broadcast %cst : f32 to vector<24x128xf32>
    %c0 = arith.constant 0 : index
    %c0_0 = arith.constant 0 : index
    %7 = vector.load %arg8[%c0, %c0_0] : memref<24x128xf32, #tpu.memory_space<vmem>>, vector<24x128xf32>
    tpu.vector_store %arg8[%c0, %c0_0], %6 {strides = array<i32>} : memref<24x128xf32, #tpu.memory_space<vmem>>, vector<24x128xf32>,
    %c0_i32 = arith.constant 0 : i32
    %8 = arith.index_cast %arg0 : i32 to index
    %9 = arith.index_cast %c0_i32 : i32 to index
    %10 = memref.load %arg3[%8, %9] : memref<2x1xi32, #tpu.memory_space<smem>>
    %11 = arith.cmpi sge, %10, %1 : i32
    %12 = arith.index_cast %arg0 : i32 to index
    %13 = arith.index_cast %c0_i32 : i32 to index
    %14 = memref.load %arg2[%12, %13] : memref<2x1xi32, #tpu.memory_space<smem>>
    %c16_i32_1 = arith.constant 16 : i32
    %15 = arith.addi %1, %c16_i32_1 : i32
    %c1_i32_2 = arith.constant 1 : i32
    %16 = arith.addi %15, %c1_i32_2 : i32
    %17 = arith.cmpi sle, %14, %16 : i32
    %18 = arith.andi %11, %17 : i1
    %19 = arith.extui %18 : i1 to i32
    %c0_i32_3 = arith.constant 0 : i32
    %20 = arith.cmpi ne, %19, %c0_i32_3 : i32
    scf.if %20 {
      %c0_19 = arith.constant 0 : index
      %52 = arith.index_cast %c0_i32 : i32 to index
      %c0_20 = arith.constant 0 : index
      %53 = vector.load %arg4[%c0_19, %52, %c0_20] : memref<1x1x128xi32, #tpu.memory_space<vmem>>, vector<1x1x128xi32>
      %54 = vector.shape_cast %53 : vector<1x1x128xi32> to vector<1x128xi32>
      %c0_21 = arith.constant 0 : index
      %55 = arith.index_cast %c0_i32 : i32 to index
      %c0_22 = arith.constant 0 : index
      %56 = vector.load %arg5[%c0_21, %55, %c0_22] : memref<1x1x128xi32, #tpu.memory_space<vmem>>, vector<1x1x128xi32>
      %57 = vector.shape_cast %56 : vector<1x1x128xi32> to vector<1x128xi32>
      %58 = vector.broadcast %4 : vector<24x1xi32> to vector<24x128xi32>
      %59 = vector.broadcast %57 : vector<1x128xi32> to vector<24x128xi32>
      %60 = arith.cmpi eq, %58, %59 : vector<24x128xi32>
      %61 = arith.extui %60 : vector<24x128xi1> to vector<24x128xi32>
      %62 = arith.sitofp %61 : vector<24x128xi32> to vector<24x128xf32>
      %63 = arith.truncf %62 : vector<24x128xf32> to vector<24x128xbf16>
      %64 = vector.broadcast %5 : vector<128x1xi32> to vector<128x128xi32>
      %65 = vector.broadcast %54 : vector<1x128xi32> to vector<128x128xi32>
      %66 = arith.cmpi eq, %64, %65 : vector<128x128xi32>
      %67 = arith.extui %66 : vector<128x128xi1> to vector<128x128xi32>
      %68 = arith.sitofp %67 : vector<128x128xi32> to vector<128x128xf32>
      %69 = arith.truncf %68 : vector<128x128xf32> to vector<128x128xbf16>
      %c0_23 = arith.constant 0 : index
      %c0_24 = arith.constant 0 : index
      %70 = vector.load %arg8[%c0_23, %c0_24] : memref<24x128xf32, #tpu.memory_space<vmem>>, vector<24x128xf32>
      "tpu.trace_start"() <{level = 10 : i32, message = "rv,cv->rc"}> : () -> ()
      %cst_25 = arith.constant dense<0.000000e+00> : vector<24x128xf32>
      %71 = tpu.matmul %63, %69, %cst_25 {dimension_numbers = #tpu.dot_dimension_numbers<[1], [1], [0], [0], [0, 0, 1, 0], [], []>} : vector<24x128xbf16>, vector<128x128xbf16>, vector<24x128xf32> -> vector<24x128xf32>
      "tpu.trace_stop"() : () -> ()
      %72 = arith.addf %70, %71 : vector<24x128xf32>
      %c0_26 = arith.constant 0 : index
      %c0_27 = arith.constant 0 : index
      %73 = vector.load %arg8[%c0_26, %c0_27] : memref<24x128xf32, #tpu.memory_space<vmem>>, vector<24x128xf32>
      tpu.vector_store %arg8[%c0_26, %c0_27], %72 {strides = array<i32>} : memref<24x128xf32, #tpu.memory_space<vmem>>, vector<24x128xf32>,
    } else {
    }
    %c1_i32_4 = arith.constant 1 : i32
    %c0_5 = arith.constant 0 : index
    %c0_6 = arith.constant 0 : index
    %21 = vector.load %arg8[%c0_5, %c0_6] : memref<24x128xf32, #tpu.memory_space<vmem>>, vector<24x128xf32>
    %cst_7 = arith.constant 5.000000e-01 : f32
    %22 = vector.broadcast %cst_7 : f32 to vector<24x128xf32>
    %23 = arith.cmpf ogt, %21, %22 : vector<24x128xf32>
    %24 = arith.extui %23 : vector<24x128xi1> to vector<24x128xi32>
    %25 = arith.sitofp %24 : vector<24x128xi32> to vector<24x128xf32>
    %26 = vector.extract_strided_slice %25 {offsets = [0, 0], sizes = [16, 128], strides = [1, 1]} : vector<24x128xf32> to vector<16x128xf32>
    %27 = vector.extract_strided_slice %25 {offsets = [1, 0], sizes = [16, 128], strides = [1, 1]} : vector<24x128xf32> to vector<16x128xf32>
    %28 = vector.extract_strided_slice %25 {offsets = [2, 0], sizes = [16, 128], strides = [1, 1]} : vector<24x128xf32> to vector<16x128xf32>
    %c1_i32_8 = arith.constant 1 : i32
    %29 = tpu.dynamic_rotate %27 by %c1_i32_8 dim 1 : vector<16x128xf32>, i32 -> vector<16x128xf32>
    %c127_i32 = arith.constant 127 : i32
    %30 = tpu.dynamic_rotate %27 by %c127_i32 dim 1 : vector<16x128xf32>, i32 -> vector<16x128xf32>
    %31 = tpu.iota {dimensions = array<i32: 1>} : vector<16x128xi32>
    %c0_i32_9 = arith.constant 0 : i32
    %32 = vector.broadcast %c0_i32_9 : i32 to vector<16x128xi32>
    %33 = arith.cmpi eq, %31, %32 : vector<16x128xi32>
    %cst_10 = arith.constant 0.000000e+00 : f32
    %34 = vector.broadcast %cst_10 : f32 to vector<16x128xf32>
    %35 = arith.select %33, %34, %29 : vector<16x128xi1>, vector<16x128xf32>
    %c15_i32 = arith.constant 15 : i32
    %36 = vector.broadcast %c15_i32 : i32 to vector<16x128xi32>
    %37 = arith.cmpi eq, %31, %36 : vector<16x128xi32>
    %cst_11 = arith.constant 0.000000e+00 : f32
    %38 = vector.broadcast %cst_11 : f32 to vector<16x128xf32>
    %39 = arith.select %37, %38, %30 : vector<16x128xi1>, vector<16x128xf32>
    %40 = arith.mulf %26, %28 : vector<16x128xf32>
    %41 = arith.mulf %40, %35 : vector<16x128xf32>
    %42 = arith.mulf %41, %39 : vector<16x128xf32>
    %c0_12 = arith.constant 0 : index
    %c0_13 = arith.constant 0 : index
    %c0_14 = arith.constant 0 : index
    %43 = vector.load %arg6[%c0_12, %c0_13, %c0_14] : memref<1x16x128xf32, #tpu.memory_space<vmem>>, vector<1x16x128xf32>
    %44 = vector.shape_cast %43 : vector<1x16x128xf32> to vector<16x128xf32>
    %45 = vector.shape_cast %27 : vector<16x128xf32> to vector<1x16x128xf32>
    tpu.vector_store %arg6[%c0_12, %c0_13, %c0_14], %45 {strides = array<i32>} : memref<1x16x128xf32, #tpu.memory_space<vmem>>, vector<1x16x128xf32>,
    %cst_15 = arith.constant 1.000000e+00 : f32
    %46 = vector.broadcast %cst_15 : f32 to vector<16x128xf32>
    %47 = arith.subf %46, %42 : vector<16x128xf32>
    %48 = arith.mulf %27, %47 : vector<16x128xf32>
    %c0_16 = arith.constant 0 : index
    %c0_17 = arith.constant 0 : index
    %c0_18 = arith.constant 0 : index
    %49 = vector.load %arg7[%c0_16, %c0_17, %c0_18] : memref<1x16x128xf32, #tpu.memory_space<vmem>>, vector<1x16x128xf32>
    %50 = vector.shape_cast %49 : vector<1x16x128xf32> to vector<16x128xf32>
    %51 = vector.shape_cast %48 : vector<16x128xf32> to vector<1x16x128xf32>
    tpu.vector_store %arg7[%c0_16, %c0_17, %c0_18], %51 {strides = array<i32>} : memref<1x16x128xf32, #tpu.memory_space<vmem>>, vector<1x16x128xf32>,
    return
  }
  func.func @transform_0(%arg0: i32, %arg1: i32, %arg2: memref<2x1xi32, #tpu.memory_space<smem>>, %arg3: memref<2x1xi32, #tpu.memory_space<smem>>) -> (i32, i32, i32) {
    %c0_i32 = arith.constant 0 : i32
    %c0_i32_0 = arith.constant 0 : i32
    %c0_i32_1 = arith.constant 0 : i32
    return %arg0, %c0_i32, %c0_i32_0 : i32, i32, i32
  }
  func.func @transform_1(%arg0: i32, %arg1: i32, %arg2: memref<2x1xi32, #tpu.memory_space<smem>>, %arg3: memref<2x1xi32, #tpu.memory_space<smem>>) -> (i32, i32, i32) {
    %c0_i32 = arith.constant 0 : i32
    %c0_i32_0 = arith.constant 0 : i32
    %c0_i32_1 = arith.constant 0 : i32
    return %arg0, %c0_i32, %c0_i32_0 : i32, i32, i32
  }
  func.func @transform_2(%arg0: i32, %arg1: i32, %arg2: memref<2x1xi32, #tpu.memory_space<smem>>, %arg3: memref<2x1xi32, #tpu.memory_space<smem>>) -> (i32, i32, i32) {
    %c0_i32 = arith.constant 0 : i32
    %c0_i32_0 = arith.constant 0 : i32
    return %arg0, %arg1, %c0_i32 : i32, i32, i32
  }
  func.func @transform_3(%arg0: i32, %arg1: i32, %arg2: memref<2x1xi32, #tpu.memory_space<smem>>, %arg3: memref<2x1xi32, #tpu.memory_space<smem>>) -> (i32, i32, i32) {
    %c0_i32 = arith.constant 0 : i32
    %c0_i32_0 = arith.constant 0 : i32
    return %arg0, %arg1, %c0_i32 : i32, i32, i32
  }
}

</mosaic_0001>

<bundles_post_ra>
// kernel: tpu_custom_call.1
= control target key start
LH: loop header
LB: loop body
LE: loop exit
PB: predicated region body
PF: predicated region fallthrough
CT: control target
= control target key end

     0   :  { %s1210_s0 = inlined_call_operand.vmem [shape: s32[2,1], index: 0, kind: input, shape index: {}]   ;;  %s1211_s2 = inlined_call_operand.vmem [shape: s32[2,1,128], index: 2, kind: input, shape index: {}]   ;;  %s1212_s3 = inlined_call_operand.vmem [shape: s32[2,1,128], index: 3, kind: input, shape index: {}]   ;;  %s1213_s4 = inlined_call_operand.hbm [shape: f32[2,16,128], index: 4, kind: output, shape index: {0}]   ;;  %s1214_s5 = inlined_call_operand.hbm [shape: f32[2,16,128], index: 5, kind: output, shape index: {1}]   ;;  %s1215_s1 = inlined_call_operand.vmem [shape: s32[2,1], index: 1, kind: input, shape index: {}]  }
   0x1   :  { %s11_s20 = sshll.u32 %s1210_s0, 4  ;;  %s15_s23 = sshll.u32 %s1215_s1, 4  ;;  %s12_s20 = int_to_ptr.vmem [resolvable:$true] %s11_s20  ;;  %s16_s23 = int_to_ptr.vmem [resolvable:$true] %s15_s23 }
   0x2   :  { %s785_s24 = scalar_lea.vmem %s12_s20, 32  ;;  %p790_p1 = scmp.lt.s32.totalorder %s12_s20, %s12_s20 }
   0x3   :  { %p786_p0 = scmp.ne.s32.totalorder %s12_s20, %s785_s24  ;;  %p791_p2 = scmp.lt.s32.totalorder %s785_s24, %s785_s24 }
   0x5   :  { %p792_p3 = por %p791_p2, %p790_p1 }
   0x7   :  { %p793_p4 = pnand %p792_p3, %p786_p0 }
   0x9   :  { %796 = shalt.err (!%p793_p4)  }
   0xa   :  { %s919_s25 = smov [#allocation4]   ;;  %s797_s26 = scalar_lea.vmem %s16_s23, 32 }
   0xb   :  { %14 = dma.vmem_to_smem %s12_s20, 32, %s919_s25, [#allocation3] }
   0xc   :  { %p798_p5 = scmp.ne.s32.totalorder %s16_s23, %s797_s26  ;;  %p802_p6 = scmp.lt.s32.totalorder %s16_s23, %s16_s23 }
   0xd   :  { %p803_p7 = scmp.lt.s32.totalorder %s797_s26, %s797_s26 }
   0xf   :  { %p804_p8 = por %p803_p7, %p802_p6 }
  0x11   :  { %p805_p9 = pnand %p804_p8, %p798_p5 }
  0x13   :  { %808 = shalt.err (!%p805_p9)  }
  0x14   :  { %s920_s0 = smov [#allocation5]  }
  0x15   :  { %18 = dma.vmem_to_smem %s16_s23, 32, %s920_s0, [#allocation3] }
  0x16   :  { %885 = dma.done.wait [#allocation3], 64 }
  0x17   :  { %886 = vsyncadd [#allocation3], 4294967232 }
  0x18   :  { %20 = sfence }
  0x19   :  { %21 = vsyncpa [#allocation7], 0 }
  0x1a   :  { %23 = vsyncpa [#allocation7 + $0x1], 0 }
  0x1b   :  { %24 = vsyncpa [#allocation9], 0 }
  0x1c   :  { %26 = vsyncpa [#allocation9 + $0x1], 0  ;;  %s965_s1 = smov 0   ;;  %s967_s27 = smov 0  }
  0x1d   :  { %s969_s28 = smov 0   ;;  %s971_s29 = smov 0  }
  0x1e   :  { %s973_s30 = smov 0   ;;  %s975_s6 = smov 0  }
  0x1f LB: > { %s615_s7 = sadd.s32 4294967295, %s917_s6   ;;  %s616_s8 = sadd.s32 4294967294, %s917_s6   ;;  %s917_s6 = sphi %s975_s6, %s32_s6   ;;  %s913_s30 = sphi %s973_s30, %s1222_s30   ;;  %s909_s29 = sphi %s971_s29, %s1221_s29   ;;  %s905_s28 = sphi %s969_s28, %s1220_s28   ;;  %s901_s27 = sphi %s967_s27, %s1219_s27   ;;  %s897_s1 = sphi %s965_s1, %s1218_s1  }
  0x20   : > { %s44_s9 = sadd.s32 1, %s913_s30  ;;  %s105_s10 = sadd.s32 1, %s905_s28 }
  0x21   : > { %p46_p10 = scmp.ge.s32.totalorder %s44_s9, 2  ;;  %p115_p11 = scmp.ne.s32.totalorder %s905_s28, %s901_s27 }
  0x22   : > { %p116_p12 = scmp.eq.s32.totalorder %s615_s7, 1  ;;  %p121_p13 = scmp.ne.s32.totalorder %s901_s27, %s897_s1 }
  0x23   : > { %s1224_s9 = smov (%p46_p10, %s44_s9), 0  ;;  %p122_p1 = scmp.eq.s32.totalorder %s616_s8, 1 }
  0x24   : > { %p1005_p0 = por %p116_p12, %p115_p11  ;;  %s100_s12 = ssub.s32 %s913_s30, %s1224_s9 }
  0x25   : > { %p619_p2 = scmp.ge.s32.totalorder %s917_s6, 1  ;;  %p103_p3 = scmp.eq.s32.totalorder %s100_s12, 0 }
  0x26   : > { %p1012_p4 = por %p122_p1, %p121_p13  ;;  %p180_p5 = scmp.lt.s32.totalorder %s917_s6, 3 }
  0x27   : > { %s1018_s14 = scalar_select %p103_p3, %s905_s28, %s105_s10  }
  0x28   : > { %p181_p6 = pnand %p619_p2, %p180_p5 }
  0x29   : > { %s1021_s15 = sand.u32 (!%p181_p6), 1, %s901_s27   ;;  %p210_p7 = scmp.lt.s32.totalorder (!%p181_p6), %s909_s29, 1 }
  0x2a   : > { %184 = sbr.rel (%p181_p6) target bundleno = 487 (0x1e7), region = 28  ;;  %s620_s16 = sshll.u32 (!%p181_p6), %s1021_s15, 4 }
  0x2b   : > { %s622_s17 = sshll.u32 (!%p181_p6), %s909_s29, 7  ;;  %s1071_s0 = scalar_lea.vmem (!%p181_p6), [#allocation6], %s620_s16 }
  0x2c   : > { %s246_s19 = sld [smem:[#allocation5 + %s622_s17]] (!%p181_p6)  ;;  %s1075_s7 = scalar_lea.vmem (!%p181_p6), [#allocation8], %s620_s16 }
  0x2d   : > { %s248_s26 = sld [smem:[#allocation4 + %s622_s17]] (!%p181_p6) }
  0x2f   : > { %v221_v0 = vlaneseq  ;;  %v921_v1 = vmov 0.0   ;;  %s1033_s18 = scalar_select %p210_p7, %s909_s29, 1 }
  0x30   : > { %242 = vst [vmem:[#allocation2 + $0x10] sm:$0xff] %v921_v1  ;;  %243 = vst [vmem:[#allocation2] sm:$0xff] %v921_v1 }
  0x31   : > { %244 = vst [vmem:[#allocation2 + $0x8] sm:$0xff] %v921_v1  ;;  %v1030_v2 = vshrl.u32 %v221_v0, 7  ;;  %s212_s22 = scalar_lea.vmem %s1211_s2, %s1033_s18  ;;  %s215_s25 = scalar_lea.vmem %s1212_s3, %s1033_s18 }
  0x32   : > { %p247_p8 = scmp.ge.s32.totalorder %s246_s19, 4294967295 }
  0x33   : > { %v1036_v3 = vadd.s32 8, %v1030_v2  ;;  %v1039_v4 = vadd.s32 16, %v1030_v2  ;;  %v226_v5 = vadd.s32 4294967295, %v1030_v2  ;;  %v1043_v6 = vadd.s32 24, %v1030_v2  ;;  %p250_p9 = scmp.le.s32.totalorder %s248_s26, 16 }
  0x34   : > { %v230_v7 = vadd.s32 32, %v1030_v2  ;;  %v231_v8 = vadd.s32 40, %v1030_v2  ;;  %v232_v9 = vadd.s32 48, %v1030_v2  ;;  %v233_v10 = vadd.s32 56, %v1030_v2 }
  0x35   : > { %v227_v11 = vadd.s32 4294967295, %v1036_v3  ;;  %v1059_v12 = vadd.s32 4294967295, %v1039_v4  ;;  %v234_v13 = vadd.s32 64, %v1030_v2  ;;  %v235_v14 = vadd.s32 72, %v1030_v2  ;;  %p251_p10 = pnand %p250_p9, %p247_p8 }
  0x36   : > { %v236_v15 = vadd.s32 80, %v1030_v2  ;;  %v237_v16 = vadd.s32 88, %v1030_v2  ;;  %v238_v17 = vadd.s32 96, %v1030_v2  ;;  %v239_v18 = vadd.s32 104, %v1030_v2 }
  0x37   : > { %v240_v19 = vadd.s32 112, %v1030_v2  ;;  %v241_v20 = vadd.s32 120, %v1030_v2  ;;  %254 = sbr.rel (%p251_p10) target bundleno = 329 (0x149), region = 32 }
  0x3c   : > { %v627_v21 = vld [vmem:[%s212_s22] ss:$0 sm:$0xff]  ;;  %v922_v22 = vmov 1.0|1.0   ;;  %v334_v24 = vld [vmem:[#allocation2 + $0x8] sm:$0xff]  ;;  %v332_v26 = vld [vmem:[#allocation2 + $0x10] sm:$0xff] }
  0x3d   : > { %vm290_vm0 = vcmp.eq.s32.totalorder %v240_v19, %v627_v21  ;;  %vm291_vm1 = vcmp.eq.s32.totalorder %v241_v20, %v627_v21  ;;  %vm288_vm2 = vcmp.eq.s32.totalorder %v238_v17, %v627_v21  ;;  %vm289_vm3 = vcmp.eq.s32.totalorder %v239_v18, %v627_v21  ;;  %v623_v23 = vld [vmem:[%s215_s25] ss:$0 sm:$0xff] }
  0x3e   : > { %vm644_vm4 = vmpackc.low %vm291_vm1, %vm290_vm0  ;;  %vm286_vm6 = vcmp.eq.s32.totalorder %v236_v15, %v627_v21  ;;  %vm287_vm7 = vcmp.eq.s32.totalorder %v237_v16, %v627_v21  ;;  %vm261_vm8 = vcmp.eq.s32.totalorder %v226_v5, %v623_v23  ;;  %vm262_vm9 = vcmp.eq.s32.totalorder %v227_v11, %v623_v23  ;;  %v333_v31 = vld [vmem:[#allocation2] sm:$0xff] }
  0x3f   : > { %687 = vmatprep.subr.msk.bf16.mxu0 %vm644_vm4, %v922_v22  ;;  %vm646_vm5 = vmpackc.low %vm289_vm3, %vm288_vm2  ;;  %vm284_vm12 = vcmp.eq.s32.totalorder %v234_v13, %v627_v21  ;;  %vm285_vm13 = vcmp.eq.s32.totalorder %v235_v14, %v627_v21  ;;  %vm282_vm15 = vcmp.eq.s32.totalorder %v232_v9, %v627_v21  ;;  %vm283_vm0 = vcmp.eq.s32.totalorder %v233_v10, %v627_v21 }
  0x40   : > { %688 = vmatpush3.bf16.xpose.msk.msra.mxu0 %vm644_vm4, %v922_v22  ;;  %vm648_vm10 = vmpackc.low %vm287_vm7, %vm286_vm6  ;;  %vm280_vm2 = vcmp.eq.s32.totalorder %v230_v7, %v627_v21  ;;  %vm281_vm3 = vcmp.eq.s32.totalorder %v231_v8, %v627_v21  ;;  %vm278_vm6 = vcmp.eq.s32.totalorder %v1039_v4, %v627_v21 }
  0x41   : > { %689 = vmatprep.subr.msk.bf16.mxu0 %vm646_vm5, %v922_v22  ;;  %vm660_vm11 = vmpackc.low %vm262_vm9, %vm261_vm8  ;;  %vm276_vm8 = vcmp.eq.s32.totalorder %v1030_v2, %v627_v21  ;;  %vm277_vm9 = vcmp.eq.s32.totalorder %v1036_v3, %v627_v21 }
  0x42   : > { %703 = vmatprep.mubr.msk.bf16.mxu0 %vm660_vm11, %v922_v22  ;;  %vm650_vm14 = vmpackc.low %vm285_vm13, %vm284_vm12  ;;  %vm263_vm11 = vcmp.eq.s32.totalorder %v1059_v12, %v623_v23 }
  0x43   : > { %vm652_vm1 = vmpackc.low %vm283_vm0, %vm282_vm15 }
  0x44   : > { %vm654_vm4 = vmpackc.low %vm281_vm3, %vm280_vm2 }
  0x45   : > { %vm662_vm12 = vmpackc.low %vm263_vm11, %vm263_vm11 }
  0x48   : > { %690 = vmatpush3.bf16.xpose.msk.msra.mxu0 %vm646_vm5, %v922_v22  ;;  %vm279_vm5 = vcmp.eq.s32.totalorder %v1043_v6, %v627_v21 }
  0x49   : > { %691 = vmatprep.subr.msk.bf16.mxu0 %vm648_vm10, %v922_v22  ;;  %vm656_vm7 = vmpackc.low %vm279_vm5, %vm278_vm6 }
  0x50   : > { %692 = vmatpush3.bf16.xpose.msk.msra.mxu0 %vm648_vm10, %v922_v22  ;;  %vm658_vm10 = vmpackc.low %vm277_vm9, %vm276_vm8 }
  0x51   : > { %693 = vmatprep.subr.msk.bf16.mxu0 %vm650_vm14, %v922_v22 }
  0x58   : > { %694 = vmatpush3.bf16.xpose.msk.msra.mxu0 %vm650_vm14, %v922_v22 }
  0x59   : > { %695 = vmatprep.subr.msk.bf16.mxu0 %vm652_vm1, %v922_v22 }
  0x60   : > { %696 = vmatpush3.bf16.xpose.msk.msra.mxu0 %vm652_vm1, %v922_v22 }
  0x61   : > { %697 = vmatprep.subr.msk.bf16.mxu0 %vm654_vm4, %v922_v22 }
  0x68   : > { %698 = vmatpush3.bf16.xpose.msk.msra.mxu0 %vm654_vm4, %v922_v22 }
  0x69   : > { %699 = vmatprep.subr.msk.bf16.mxu0 %vm656_vm7, %v922_v22 }
  0x70   : > { %700 = vmatpush3.bf16.xpose.msk.msra.mxu0 %vm656_vm7, %v922_v22 }
  0x71   : > { %701 = vmatprep.subr.msk.bf16.mxu0 %vm658_vm10, %v922_v22 }
  0x78   : > { %702 = vmatpush3.bf16.xpose.msk.msra.mxu0 %vm658_vm10, %v922_v22 }
  0x7f   : > { %704 = vmatmul.mubr.msk.bf16.vlgmr.msra.gmra.mxu0 %vm662_vm12, %v922_v22 }
 0x13f   : > { %v705_v25 = vpop.f32.mrf.mxu0 }
 0x140   : > { %v385_v27 = vadd.f32 %v705_v25, %v334_v24 }
 0x141   : > { %v369_v28 = vpop.f32.mrf.mxu0 }
 0x142   : > { %388 = vst [vmem:[#allocation2 + $0x8] sm:$0xff] %v385_v27  ;;  %v383_v29 = vadd.f32 %v369_v28, %v332_v26 }
 0x143   : > { %v706_v30 = vpop.f32.mrf.mxu0 }
 0x144   : > { %386 = vst [vmem:[#allocation2 + $0x10] sm:$0xff] %v383_v29 }
 0x145   : > { %v372_v32 = vpop.f32.mrf.mxu0 }
 0x146   : > { %v384_v33 = vadd.f32 %v372_v32, %v333_v31 }
 0x148   : > { %387 = vst [vmem:[#allocation2] sm:$0xff] %v384_v33 }
 0x149 PF: > { %v391_v36 = vld [vmem:[#allocation2 + $0x8] sm:$0xff]  ;;  %vm404_vm0 = vcmask 1046528   ;;  %s923_s12 = smov 1   ;;  %s675_s16 = sshll.u32 %s909_s29, 8 }
 0x14a   : > { %vm394_vm15 = vcmp.gt.f32.partialorder %v391_v36, 0.5  ;;  %s483_s17 = sshll.u32 %s1071_s0, 4  ;;  %s1112_s20 = scalar_lea.hbm %s1213_s4, %s675_s16  ;;  %s1114_s17 = int_to_ptr.vmem [resolvable:$true] %s483_s17 }
 0x14b   : > { %v389_v34 = vld [vmem:[#allocation2 + $0x10] sm:$0xff]  ;;  %v1094_v39 = vsel %vm394_vm15, 1.0, %v921_v1  ;;  %s924_s21 = smov 127   ;;  %s463_s22 = scalar_lea.sflag [#allocation7], %s1021_s15 }
 0x14c   : > { %vm392_vm13 = vcmp.gt.f32.partialorder %v389_v34, 0.5  ;;  %v408_v42 = vrot.slane %v1094_v39, 1  ;;  %444 = vst [vmem:[%s1071_s0 + $0xf] sm:$0x1] %v1094_v39  ;;  %s809_s23 = scalar_lea.vmem %s1114_s17, 256  ;;  %s925_s24 = smov [#allocation6]  }
 0x14d   : > { %v1088_v37 = vsel %vm392_vm13, 1.0, %v921_v1  ;;  %p810_p11 = scmp.ne.s32.totalorder %s1114_s17, %s809_s23  ;;  %s813_s25 = sshll.u32 %s925_s24, 4  ;;  %s814_s25 = int_to_ptr.vmem [resolvable:$false] %s813_s25 }
 0x14e   : > { %v405_v40 = vrot.slane %v1088_v37, 1  ;;  %442 = vst [vmem:[%s1071_s0 - $0x1] sm:$0xfe] %v1088_v37  ;;  %s815_s26 = scalar_lea.vmem %s814_s25, 512  ;;  %p816_p1 = scmp.lt.s32.totalorder %s1114_s17, %s814_s25 }
 0x14f   : > { %v390_v35 = vld [vmem:[#allocation2] sm:$0xff]  ;;  %p811_p12 = pnand %p810_p11, %p1005_p0  ;;  %p817_p2 = scmp.lt.s32.totalorder %s815_s26, %s809_s23 }
 0x150   : > { %vm393_vm14 = vcmp.gt.f32.partialorder %v390_v35, 0.5 }
 0x151   : > { %v1091_v38 = vsel %vm393_vm14, 1.0, %v921_v1  ;;  %p812_p13 = pneg %p811_p12  ;;  %p818_p3 = por %p817_p2, %p816_p1 }
 0x152   : > { %v406_v41 = vrot.slane %v1091_v38, 1  ;;  %443 = vst [vmem:[%s1071_s0 + $0x7] sm:$0xff] %v1091_v38 }
 0x153   : > { %p819_p5 = pnand %p818_p3, %p812_p13 }
 0x154   : > { %v407_v43 = vsel %vm404_vm0, %v405_v40, %v406_v41  ;;  %v409_v44 = vsel %vm404_vm0, %v406_v41, %v408_v42 }
 0x155   : > { %v775_v45 = vpack.i.bf16 %v409_v44, %v407_v43 }
 0x157   : > { %776 = vrot.lane.b32.xlu0 %v775_v45, %s923_s12 }
 0x15b   : > { %781 = vrot.lane.b32.xlu0 %v775_v45, %s924_s21 }
 0x15c   : > { %822 = shalt.err (!%p819_p5)
}
 0x15d   : > { %s823_s0 = scalar_lea.hbm %s1112_s20, 256  ;;  %s827_s12 = scalar_lea.hbm %s1213_s4, 512 }
 0x15e   : > { %p824_p6 = scmp.ne.s32.totalorder %s1112_s20, %s823_s0  ;;  %p828_p9 = scmp.lt.s32.totalorder %s1112_s20, %s1213_s4 }
 0x15f   : > { %p829_p10 = scmp.lt.s32.totalorder %s827_s12, %s823_s0 }
 0x160   : > { %p825_p7 = pnand %p824_p6, %p1005_p0 }
 0x161   : > { %p830_p11 = por %p829_p10, %p828_p9 }
 0x162   : > { %p826_p8 = pneg %p825_p7 }
 0x164   : > { %p831_p12 = pnand %p830_p11, %p826_p8 }
 0x166   : > { %834 = shalt.err (!%p831_p12)
}
 0x167   : > { %s926_s21 = smov 128   ;;  %s927_s23 = smov 8   ;;  %v429_v46 = vrot.slane %v1088_v37, 2  ;;  %v430_v47 = vrot.slane %v1091_v38, 2  ;;  %v432_v48 = vrot.slane %v1094_v39, 2  ;;  %v421_v49 = vand.u32 127, %v221_v0 }
 0x168   : > { %707 = dma.vmem_to_hbm [thread:$0]  (%p1005_p0), %s1114_s17, 256, %s1112_s20, %s463_s22, %s926_s21, %s926_s21, %s927_s23   ;;  %vm428_vm1 = vcmask 1045504   ;;  %vm449_vm4 = vcmask 1040384  }
 0x169   : > { %v431_v50 = vsel %vm428_vm1, %v429_v46, %v430_v47  ;;  %v433_v51 = vsel %vm428_vm1, %v430_v47, %v432_v48  ;;  %vm422_vm2 = vcmp.eq.s32.totalorder %v421_v49, 0  ;;  %vm425_vm3 = vcmp.eq.s32.totalorder %v421_v49, 15  ;;  %s501_s17 = sshll.u32 %s1075_s7, 4  ;;  %s1157_s24 = scalar_lea.hbm %s1214_s5, %s675_s16  ;;  %s1159_s17 = int_to_ptr.vmem [resolvable:$true] %s501_s17 }
 0x16a   : > { %v436_v55 = vmul.f32 %v1088_v37, %v431_v50  ;;  %v437_v56 = vmul.f32 %v1091_v38, %v433_v51  ;;  %s468_s25 = scalar_lea.sflag [#allocation9], %s1021_s15  ;;  %s835_s26 = scalar_lea.vmem %s1159_s17, 256 }
 0x16b   : > { %p836_p13 = scmp.ne.s32.totalorder %s1159_s17, %s835_s26  ;;  %s928_s29 = smov [#allocation8]  }
 0x16c   : > { %s839_s0 = sshll.u32 %s928_s29, 4  ;;  %s840_s0 = int_to_ptr.vmem [resolvable:$false] %s839_s0 }
 0x16d   : > { %p837_p1 = pnand %p836_p13, %p1005_p0  ;;  %s841_s8 = scalar_lea.vmem %s840_s0, 512 }
 0x16e   : > { %p842_p3 = scmp.lt.s32.totalorder %s1159_s17, %s840_s0  ;;  %p843_p5 = scmp.lt.s32.totalorder %s841_s8, %s835_s26 }
 0x16f   : > { %p838_p2 = pneg %p837_p1 }
 0x170   : > { %p844_p6 = por %p843_p5, %p842_p3 }
 0x172   : > { %p845_p7 = pnand %p844_p6, %p838_p2 }
 0x1c9   : > { %v777_v52 = vpop.permute.xlu0 %776 }
 0x1ca   : > { %v779_v53 = vunpack.i.h.bf16 %v777_v52  ;;  %v778_v54 = vunpack.i.l.bf16 %v777_v52 }
 0x1cc   : > { %v424_v57 = vsel %vm422_vm2, 0.0, %v779_v53  ;;  %v423_v58 = vsel %vm422_vm2, 0.0, %v778_v54 }
 0x1cd   : > { %v782_v59 = vpop.permute.xlu0 %781  ;;  %v439_v62 = vmul.f32 %v437_v56, %v424_v57  ;;  %v438_v63 = vmul.f32 %v436_v55, %v423_v58 }
 0x1ce   : > { %v784_v60 = vunpack.i.h.bf16 %v782_v59  ;;  %v783_v61 = vunpack.i.l.bf16 %v782_v59 }
 0x1d0   : > { %v427_v0 = vsel %vm425_vm3, 0.0, %v784_v60  ;;  %v426_v1 = vsel %vm425_vm3, 0.0, %v783_v61 }
 0x1d1   : > { %v440_v2 = vmul.f32 %v438_v63, %v426_v1  ;;  %v441_v3 = vmul.f32 %v439_v62, %v427_v0 }
 0x1d3   : > { %v445_v4 = vsub.f32 1.0, %v440_v2  ;;  %v446_v5 = vsub.f32 1.0, %v441_v3 }
 0x1d5   : > { %v450_v6 = vrot.slane %v445_v4, 7  ;;  %v451_v7 = vrot.slane %v446_v5, 7 }
 0x1d7   : > { %v452_v8 = vsel %vm449_vm4, %v450_v6, %v451_v7  ;;  %v456_v9 = vmul.f32 %v1088_v37, %v450_v6  ;;  %v458_v10 = vmul.f32 %v1094_v39, %v451_v7 }
 0x1d8   : > { %v457_v11 = vmul.f32 %v1091_v38, %v452_v8 }
 0x1d9   : > { %459 = vst [vmem:[%s1075_s7 - $0x1] sm:$0xfe] %v456_v9  ;;  %461 = vst [vmem:[%s1075_s7 + $0xf] sm:$0x1] %v458_v10 }
 0x1da   : > { %460 = vst [vmem:[%s1075_s7 + $0x7] sm:$0xff] %v457_v11 }
 0x1db   : > { %848 = shalt.err (!%p845_p7)
}
 0x1dc   : > { %s849_s7 = scalar_lea.hbm %s1157_s24, 256  ;;  %s853_s10 = scalar_lea.hbm %s1214_s5, 512 }
 0x1dd   : > { %p850_p8 = scmp.ne.s32.totalorder %s1157_s24, %s849_s7  ;;  %p854_p11 = scmp.lt.s32.totalorder %s1157_s24, %s1214_s5 }
 0x1de   : > { %p855_p12 = scmp.lt.s32.totalorder %s853_s10, %s849_s7 }
 0x1df   : > { %p851_p9 = pnand %p850_p8, %p1005_p0 }
 0x1e0   : > { %p856_p13 = por %p855_p12, %p854_p11 }
 0x1e1   : > { %p852_p10 = pneg %p851_p9 }
 0x1e3   : > { %p857_p1 = pnand %p856_p13, %p852_p10 }
 0x1e5   : > { %860 = shalt.err (!%p857_p1)
}
 0x1e6   : > { %708 = dma.vmem_to_hbm [thread:$0]  (%p1005_p0), %s1159_s17, 256, %s1157_s24, %s468_s25, %s926_s21, %s926_s21, %s927_s23  }
 0x1e7 PF: > { %p718_p2 = scmp.ge.s32.totalorder %s917_s6, 2  ;;  %s516_s19 = sand.u32 1, %s897_s1  }
 0x1e8   : > { %s517_s20 = scalar_lea.sflag [#allocation7], %s516_s19 }
 0x1e9   : > { %p712_p3 = pnand %p718_p2, %p1012_p4 }
 0x1eb   : > { %p713_p5 = pneg %p712_p3 }
 0x1ed   : > { %888 = dma.done.wait (%p713_p5), %s517_s20, 256  }
 0x1ee   : > { %890 = vsyncadd (%p713_p5), %s517_s20, 4294967040  ;;  %s526_s22 = scalar_lea.sflag [#allocation9], %s516_s19 }
 0x1ef   : > { %892 = dma.done.wait (%p713_p5), %s526_s22, 256  }
 0x1f0   : > { %894 = vsyncadd (%p713_p5), %s526_s22, 4294967040  ;;  %s32_s6 = sadd.s32 1, %s917_s6   ;;  %s1218_s1 = smov %s901_s27 }
 0x1f1   : > { %p29_p6 = scmp.ge.s32.totalorder %s32_s6, 4   ;;  %s1219_s27 = smov %s905_s28 }
 0x1f2   : > { %s1220_s28 = smov %s1018_s14  ;;  %s1221_s29 = smov %s913_s30 }
 0x1f3   : > { %s1222_s30 = smov %s1224_s9  ;;  %31 = sbr.rel (!%p29_p6) target bundleno = 31 (0x1f), region = 87 }
 0x1f8   :  { %531 = vsyncpa [#allocation7], 1 }
 0x1f9   :  { %533 = vsyncpa [#allocation7 + $0x1], 1 }
 0x1fa   :  { %534 = vsyncpa [#allocation9], 1 }
 0x1fb   :  { %536 = vsyncpa [#allocation9 + $0x1], 1 }

</bundles_post_ra>
